<compile_context>
chip_gen: v5e
topology: v5e:2x2
jax: 0.10.0
libtpu: 0.0.40
codegen_flags: <defaults>
</compile_context>

<pallas_src>
import functools

import jax
import jax.numpy as jnp
from jax.experimental import pallas as pl
from jax.experimental.pallas import tpu as pltpu

LN_EPS = 1e-5          # nn.LayerNorm default eps
LEAKY_SLOPE = 0.01     # nn.LeakyReLU default negative_slope
LANE = 128             # TPU lane width


def _layer_norm(h, n_valid=None):
    """Affine-free LayerNorm with single-pass statistics.

    If `n_valid` is given, only the first `n_valid` lanes are meaningful and all
    remaining lanes are exact zeros, so full-width sums equal sums over the valid
    lanes; the divisor is `n_valid`.  Padded lanes hold garbage after normalization
    and are sliced off by the caller.
    """
    n = h.shape[-1] if n_valid is None else n_valid
    inv_n = 1.0 / n
    s1 = jnp.sum(h, axis=-1, keepdims=True)
    s2 = jnp.sum(h * h, axis=-1, keepdims=True)   # independent of s1 -> reduces overlap
    mean = s1 * inv_n
    var = jnp.maximum(s2 * inv_n - mean * mean, 0.0)
    return (h - mean) * jax.lax.rsqrt(var + LN_EPS)


def _block(x, w, b):
    # Linear -> [eval BN elided] -> LayerNorm -> LeakyReLU -> Dropout(identity in eval)
    h = jnp.dot(x, w, preferred_element_type=jnp.float32) + b
    h = _layer_norm(h)
    return jnp.where(h >= 0.0, h, LEAKY_SLOPE * h)


def st_vae_kernel(
    x_ref, eps_ref,
    enc_w_ref, enc_b_ref,
    muvar_w_ref, muvar_b_ref,
    dec_w_ref, dec_b_ref,
    fin_w_ref, fin_b_ref,
    out_ref,
    *, n_latent, n_class,
):
    x = x_ref[...]

    # ---- encoder ----
    h = _block(x, enc_w_ref[...], enc_b_ref[...])

    # fused mu | log_var projection (zero-padded to 128 output lanes)
    muvar = jnp.dot(h, muvar_w_ref[...], preferred_element_type=jnp.float32) + muvar_b_ref[...]
    mu = muvar[:, :n_latent]
    log_var = muvar[:, n_latent:2 * n_latent]

    # ---- reparameterize ----
    z = eps_ref[...] * jnp.exp(0.5 * log_var) + mu

    # ---- decoder + final layer ----
    d = _block(z, dec_w_ref[...], dec_b_ref[...])
    f_ = jnp.dot(d, fin_w_ref[...], preferred_element_type=jnp.float32) + fin_b_ref[...]
    # Padded columns of f_ are exact zeros; LayerNorm stats divide by n_class only.
    y_full = jnp.tanh(_layer_norm(f_, n_valid=n_class))

    # ---- single lane-dense (2B, 128) store: rows [0,B)=mu|logvar|pad, [B,2B)=y|pad ----
    out_ref[...] = jnp.concatenate([muvar, y_full], axis=0)


def st_vae_forward(x, eps, params):
    B, _ = x.shape
    n_latent = params["mu_w"].shape[1]
    n_class = params["fin_w"].shape[1]

    # Host-side weight prep (fused/padded once under jit): fuse mu|var and zero-pad
    # the two "output-facing" projections to 128 lanes for unmasked stores.
    muvar_w = jnp.concatenate([params["mu_w"], params["var_w"]], axis=1)
    muvar_b = jnp.concatenate([params["mu_b"], params["var_b"]], axis=1)
    muvar_w = jnp.pad(muvar_w, ((0, 0), (0, LANE - 2 * n_latent)))
    muvar_b = jnp.pad(muvar_b, ((0, 0), (0, LANE - 2 * n_latent)))
    fin_w = jnp.pad(params["fin_w"], ((0, 0), (0, LANE - n_class)))
    fin_b = jnp.pad(params["fin_b"], ((0, 0), (0, LANE - n_class)))

    args = (
        x, eps,
        params["enc_w"], params["enc_b"],
        muvar_w, muvar_b,
        params["dec_w"], params["dec_b"],
        fin_w, fin_b,
    )

    vmem = lambda: pl.BlockSpec(memory_space=pltpu.MemorySpace.VMEM)

    slab = pl.pallas_call(
        functools.partial(st_vae_kernel, n_latent=n_latent, n_class=n_class),
        out_shape=jax.ShapeDtypeStruct((2 * B, LANE), jnp.float32),
        in_specs=[vmem() for _ in args],
        out_specs=vmem(),
    )(*args)

    mu = slab[:B, :n_latent]
    log_var = slab[:B, n_latent:2 * n_latent]
    y_proportion = slab[B:, :n_class]

    # Parameter-only transforms: independent of x/eps, hoisted out of the kernel.
    scale = jax.nn.sigmoid(params["scale"])
    additive = jnp.exp(params["additive"])

    return y_proportion, scale, additive, mu, log_var


if __name__ == "__main__":
    # Small shapes consistent with the module (n_layers=2 -> one block per coder).
    B, n_input, n_hidden, n_latent, n_class = 8, 32, 32, 16, 8

    key = jax.random.PRNGKey(0)
    keys = jax.random.split(key, 14)

    def init(k, shape, s=0.1):
        return jax.random.normal(k, shape, jnp.float32) * s

    params = dict(
        enc_w=init(keys[0], (n_input, n_hidden)),
        enc_b=init(keys[1], (1, n_hidden)),
        mu_w=init(keys[2], (n_hidden, n_latent)),
        mu_b=init(keys[3], (1, n_latent)),
        var_w=init(keys[4], (n_hidden, n_latent)),
        var_b=init(keys[5], (1, n_latent)),
        dec_w=init(keys[6], (n_latent, n_hidden)),
        dec_b=init(keys[7], (1, n_hidden)),
        fin_w=init(keys[8], (n_hidden, n_class)),
        fin_b=init(keys[9], (1, n_class)),
        scale=init(keys[10], (n_input,), 1.0),      # nn.Parameter(torch.randn(n_input))
        additive=init(keys[11], (n_input,), 1.0),   # nn.Parameter(torch.randn(n_input))
    )

    x = jax.random.normal(keys[12], (B, n_input), jnp.float32)
    eps = jax.random.normal(keys[13], (B, n_latent), jnp.float32)  # reparameterization noise

    outs = jax.jit(st_vae_forward)(x, eps, params)
    jax.block_until_ready(outs)
    print("KERNEL_OK")
</pallas_src>

<mosaic_0001>
module attributes {stable_mosaic.version = 11 : i64} {
  func.func @st_vae_kernel(%arg0: memref<8x32xf32, #tpu.memory_space<vmem>>, %arg1: memref<8x16xf32, #tpu.memory_space<vmem>>, %arg2: memref<32x32xf32, #tpu.memory_space<vmem>>, %arg3: memref<1x32xf32, #tpu.memory_space<vmem>>, %arg4: memref<32x128xf32, #tpu.memory_space<vmem>>, %arg5: memref<1x128xf32, #tpu.memory_space<vmem>>, %arg6: memref<16x32xf32, #tpu.memory_space<vmem>>, %arg7: memref<1x32xf32, #tpu.memory_space<vmem>>, %arg8: memref<32x128xf32, #tpu.memory_space<vmem>>, %arg9: memref<1x128xf32, #tpu.memory_space<vmem>>, %arg10: memref<16x128xf32, #tpu.memory_space<vmem>>) attributes {dimension_semantics = [], scalar_prefetch = 0 : i64, scratch_operands = 0 : i64, tpu.core_type = #tpu.core_type<tc>} {
    %c0 = arith.constant 0 : index
    %c0_0 = arith.constant 0 : index
    %0 = vector.load %arg0[%c0, %c0_0] : memref<8x32xf32, #tpu.memory_space<vmem>>, vector<8x32xf32>
    %c0_1 = arith.constant 0 : index
    %c0_2 = arith.constant 0 : index
    %1 = vector.load %arg2[%c0_1, %c0_2] : memref<32x32xf32, #tpu.memory_space<vmem>>, vector<32x32xf32>
    %c0_3 = arith.constant 0 : index
    %c0_4 = arith.constant 0 : index
    %2 = vector.load %arg3[%c0_3, %c0_4] : memref<1x32xf32, #tpu.memory_space<vmem>>, vector<1x32xf32>
    %cst = arith.constant dense<0.000000e+00> : vector<8x32xf32>
    %3 = tpu.matmul %0, %1, %cst {dimension_numbers = #tpu.dot_dimension_numbers<[1], [0], [0], [1], [0, 0, 1, 1], [], []>} : vector<8x32xf32>, vector<32x32xf32>, vector<8x32xf32> -> vector<8x32xf32>
    %4 = vector.broadcast %2 : vector<1x32xf32> to vector<8x32xf32>
    %5 = arith.addf %3, %4 : vector<8x32xf32>
    %cst_5 = arith.constant dense<0.000000e+00> : vector<8xf32>
    %6 = vector.multi_reduction <add>, %5, %cst_5 [1] : vector<8x32xf32> to vector<8xf32>
    %7 = vector.shape_cast %6 : vector<8xf32> to vector<8x1xf32>
    %8 = arith.mulf %5, %5 : vector<8x32xf32>
    %cst_6 = arith.constant dense<0.000000e+00> : vector<8xf32>
    %9 = vector.multi_reduction <add>, %8, %cst_6 [1] : vector<8x32xf32> to vector<8xf32>
    %10 = vector.shape_cast %9 : vector<8xf32> to vector<8x1xf32>
    %cst_7 = arith.constant 3.125000e-02 : f32
    %11 = vector.broadcast %cst_7 : f32 to vector<8x1xf32>
    %12 = arith.mulf %7, %11 : vector<8x1xf32>
    %cst_8 = arith.constant 3.125000e-02 : f32
    %13 = vector.broadcast %cst_8 : f32 to vector<8x1xf32>
    %14 = arith.mulf %10, %13 : vector<8x1xf32>
    %15 = arith.mulf %12, %12 : vector<8x1xf32>
    %16 = arith.subf %14, %15 : vector<8x1xf32>
    %cst_9 = arith.constant 0.000000e+00 : f32
    %17 = vector.broadcast %cst_9 : f32 to vector<8x1xf32>
    %18 = arith.maximumf %16, %17 : vector<8x1xf32>
    %19 = vector.broadcast %12 : vector<8x1xf32> to vector<8x32xf32>
    %20 = arith.subf %5, %19 : vector<8x32xf32>
    %cst_10 = arith.constant 9.99999974E-6 : f32
    %21 = vector.broadcast %cst_10 : f32 to vector<8x1xf32>
    %22 = arith.addf %18, %21 : vector<8x1xf32>
    %23 = math.rsqrt %22 : vector<8x1xf32>
    %24 = vector.broadcast %23 : vector<8x1xf32> to vector<8x32xf32>
    %25 = arith.mulf %20, %24 : vector<8x32xf32>
    %cst_11 = arith.constant 0.000000e+00 : f32
    %26 = vector.broadcast %cst_11 : f32 to vector<8x32xf32>
    %27 = arith.cmpf oge, %25, %26 : vector<8x32xf32>
    %cst_12 = arith.constant 0.00999999977 : f32
    %28 = vector.broadcast %cst_12 : f32 to vector<8x32xf32>
    %29 = arith.mulf %28, %25 : vector<8x32xf32>
    %30 = arith.select %27, %25, %29 : vector<8x32xi1>, vector<8x32xf32>
    %c0_13 = arith.constant 0 : index
    %c0_14 = arith.constant 0 : index
    %31 = vector.load %arg4[%c0_13, %c0_14] : memref<32x128xf32, #tpu.memory_space<vmem>>, vector<32x128xf32>
    %cst_15 = arith.constant dense<0.000000e+00> : vector<8x128xf32>
    %32 = tpu.matmul %30, %31, %cst_15 {dimension_numbers = #tpu.dot_dimension_numbers<[1], [0], [0], [1], [0, 0, 1, 1], [], []>} : vector<8x32xf32>, vector<32x128xf32>, vector<8x128xf32> -> vector<8x128xf32>
    %c0_16 = arith.constant 0 : index
    %c0_17 = arith.constant 0 : index
    %33 = vector.load %arg5[%c0_16, %c0_17] : memref<1x128xf32, #tpu.memory_space<vmem>>, vector<1x128xf32>
    %34 = vector.broadcast %33 : vector<1x128xf32> to vector<8x128xf32>
    %35 = arith.addf %32, %34 : vector<8x128xf32>
    %36 = vector.extract_strided_slice %35 {offsets = [0, 0], sizes = [8, 16], strides = [1, 1]} : vector<8x128xf32> to vector<8x16xf32>
    %37 = vector.extract_strided_slice %35 {offsets = [0, 16], sizes = [8, 16], strides = [1, 1]} : vector<8x128xf32> to vector<8x16xf32>
    %c0_18 = arith.constant 0 : index
    %c0_19 = arith.constant 0 : index
    %38 = vector.load %arg1[%c0_18, %c0_19] : memref<8x16xf32, #tpu.memory_space<vmem>>, vector<8x16xf32>
    %cst_20 = arith.constant 5.000000e-01 : f32
    %39 = vector.broadcast %cst_20 : f32 to vector<8x16xf32>
    %40 = arith.mulf %39, %37 : vector<8x16xf32>
    %41 = math.exp %40 : vector<8x16xf32>
    %42 = arith.mulf %38, %41 : vector<8x16xf32>
    %43 = arith.addf %42, %36 : vector<8x16xf32>
    %c0_21 = arith.constant 0 : index
    %c0_22 = arith.constant 0 : index
    %44 = vector.load %arg6[%c0_21, %c0_22] : memref<16x32xf32, #tpu.memory_space<vmem>>, vector<16x32xf32>
    %c0_23 = arith.constant 0 : index
    %c0_24 = arith.constant 0 : index
    %45 = vector.load %arg7[%c0_23, %c0_24] : memref<1x32xf32, #tpu.memory_space<vmem>>, vector<1x32xf32>
    %cst_25 = arith.constant dense<0.000000e+00> : vector<8x32xf32>
    %46 = tpu.matmul %43, %44, %cst_25 {dimension_numbers = #tpu.dot_dimension_numbers<[1], [0], [0], [1], [0, 0, 1, 1], [], []>} : vector<8x16xf32>, vector<16x32xf32>, vector<8x32xf32> -> vector<8x32xf32>
    %47 = vector.broadcast %45 : vector<1x32xf32> to vector<8x32xf32>
    %48 = arith.addf %46, %47 : vector<8x32xf32>
    %cst_26 = arith.constant dense<0.000000e+00> : vector<8xf32>
    %49 = vector.multi_reduction <add>, %48, %cst_26 [1] : vector<8x32xf32> to vector<8xf32>
    %50 = vector.shape_cast %49 : vector<8xf32> to vector<8x1xf32>
    %51 = arith.mulf %48, %48 : vector<8x32xf32>
    %cst_27 = arith.constant dense<0.000000e+00> : vector<8xf32>
    %52 = vector.multi_reduction <add>, %51, %cst_27 [1] : vector<8x32xf32> to vector<8xf32>
    %53 = vector.shape_cast %52 : vector<8xf32> to vector<8x1xf32>
    %cst_28 = arith.constant 3.125000e-02 : f32
    %54 = vector.broadcast %cst_28 : f32 to vector<8x1xf32>
    %55 = arith.mulf %50, %54 : vector<8x1xf32>
    %cst_29 = arith.constant 3.125000e-02 : f32
    %56 = vector.broadcast %cst_29 : f32 to vector<8x1xf32>
    %57 = arith.mulf %53, %56 : vector<8x1xf32>
    %58 = arith.mulf %55, %55 : vector<8x1xf32>
    %59 = arith.subf %57, %58 : vector<8x1xf32>
    %cst_30 = arith.constant 0.000000e+00 : f32
    %60 = vector.broadcast %cst_30 : f32 to vector<8x1xf32>
    %61 = arith.maximumf %59, %60 : vector<8x1xf32>
    %62 = vector.broadcast %55 : vector<8x1xf32> to vector<8x32xf32>
    %63 = arith.subf %48, %62 : vector<8x32xf32>
    %cst_31 = arith.constant 9.99999974E-6 : f32
    %64 = vector.broadcast %cst_31 : f32 to vector<8x1xf32>
    %65 = arith.addf %61, %64 : vector<8x1xf32>
    %66 = math.rsqrt %65 : vector<8x1xf32>
    %67 = vector.broadcast %66 : vector<8x1xf32> to vector<8x32xf32>
    %68 = arith.mulf %63, %67 : vector<8x32xf32>
    %cst_32 = arith.constant 0.000000e+00 : f32
    %69 = vector.broadcast %cst_32 : f32 to vector<8x32xf32>
    %70 = arith.cmpf oge, %68, %69 : vector<8x32xf32>
    %cst_33 = arith.constant 0.00999999977 : f32
    %71 = vector.broadcast %cst_33 : f32 to vector<8x32xf32>
    %72 = arith.mulf %71, %68 : vector<8x32xf32>
    %73 = arith.select %70, %68, %72 : vector<8x32xi1>, vector<8x32xf32>
    %c0_34 = arith.constant 0 : index
    %c0_35 = arith.constant 0 : index
    %74 = vector.load %arg8[%c0_34, %c0_35] : memref<32x128xf32, #tpu.memory_space<vmem>>, vector<32x128xf32>
    %cst_36 = arith.constant dense<0.000000e+00> : vector<8x128xf32>
    %75 = tpu.matmul %73, %74, %cst_36 {dimension_numbers = #tpu.dot_dimension_numbers<[1], [0], [0], [1], [0, 0, 1, 1], [], []>} : vector<8x32xf32>, vector<32x128xf32>, vector<8x128xf32> -> vector<8x128xf32>
    %c0_37 = arith.constant 0 : index
    %c0_38 = arith.constant 0 : index
    %76 = vector.load %arg9[%c0_37, %c0_38] : memref<1x128xf32, #tpu.memory_space<vmem>>, vector<1x128xf32>
    %77 = vector.broadcast %76 : vector<1x128xf32> to vector<8x128xf32>
    %78 = arith.addf %75, %77 : vector<8x128xf32>
    %cst_39 = arith.constant dense<0.000000e+00> : vector<8xf32>
    %79 = vector.multi_reduction <add>, %78, %cst_39 [1] : vector<8x128xf32> to vector<8xf32>
    %80 = vector.shape_cast %79 : vector<8xf32> to vector<8x1xf32>
    %81 = arith.mulf %78, %78 : vector<8x128xf32>
    %cst_40 = arith.constant dense<0.000000e+00> : vector<8xf32>
    %82 = vector.multi_reduction <add>, %81, %cst_40 [1] : vector<8x128xf32> to vector<8xf32>
    %83 = vector.shape_cast %82 : vector<8xf32> to vector<8x1xf32>
    %cst_41 = arith.constant 1.250000e-01 : f32
    %84 = vector.broadcast %cst_41 : f32 to vector<8x1xf32>
    %85 = arith.mulf %80, %84 : vector<8x1xf32>
    %cst_42 = arith.constant 1.250000e-01 : f32
    %86 = vector.broadcast %cst_42 : f32 to vector<8x1xf32>
    %87 = arith.mulf %83, %86 : vector<8x1xf32>
    %88 = arith.mulf %85, %85 : vector<8x1xf32>
    %89 = arith.subf %87, %88 : vector<8x1xf32>
    %cst_43 = arith.constant 0.000000e+00 : f32
    %90 = vector.broadcast %cst_43 : f32 to vector<8x1xf32>
    %91 = arith.maximumf %89, %90 : vector<8x1xf32>
    %92 = vector.broadcast %85 : vector<8x1xf32> to vector<8x128xf32>
    %93 = arith.subf %78, %92 : vector<8x128xf32>
    %cst_44 = arith.constant 9.99999974E-6 : f32
    %94 = vector.broadcast %cst_44 : f32 to vector<8x1xf32>
    %95 = arith.addf %91, %94 : vector<8x1xf32>
    %96 = math.rsqrt %95 : vector<8x1xf32>
    %97 = vector.broadcast %96 : vector<8x1xf32> to vector<8x128xf32>
    %98 = arith.mulf %93, %97 : vector<8x128xf32>
    %99 = math.tanh %98 : vector<8x128xf32>
    %100 = tpu.concatenate %35, %99 in 0 : vector<8x128xf32>, vector<8x128xf32> -> vector<16x128xf32>
    %c0_45 = arith.constant 0 : index
    %c0_46 = arith.constant 0 : index
    %101 = vector.load %arg10[%c0_45, %c0_46] : memref<16x128xf32, #tpu.memory_space<vmem>>, vector<16x128xf32>
    tpu.vector_store %arg10[%c0_45, %c0_46], %100 {strides = array<i32>} : memref<16x128xf32, #tpu.memory_space<vmem>>, vector<16x128xf32>,
    return
  }
}

</mosaic_0001>

<bundles_post_ra>
// kernel: st_vae_forward.1
= control target key start
LH: loop header
LB: loop body
LE: loop exit
PB: predicated region body
PF: predicated region fallthrough
CT: control target
= control target key end

     0   :  { %vm44_vm0 = vcmask 261120   ;;  %s275_s13 = smov 112   ;;  %vm143_vm5 = vcmask 130048   ;;  %s404_s2 = inlined_call_operand.vmem [shape: f32[32,32], index: 2, kind: input, shape index: {}]   ;;  %s405_s3 = inlined_call_operand.vmem [shape: f32[1,32], index: 3, kind: input, shape index: {}]   ;;  %s406_s0 = inlined_call_operand.vmem [shape: f32[8,32], index: 0, kind: input, shape index: {}]   ;;  %s407_s5 = inlined_call_operand.vmem [shape: f32[1,128], index: 5, kind: input, shape index: {}]   ;;  %s408_s4 = inlined_call_operand.vmem [shape: f32[32,128], index: 4, kind: input, shape index: {}]   ;;  %s409_s10 = inlined_call_operand.vmem [shape: f32[16,128], index: 10, kind: output, shape index: {}]   ;;  %s410_s7 = inlined_call_operand.vmem [shape: f32[1,32], index: 7, kind: input, shape index: {}]   ;;  %s411_s6 = inlined_call_operand.vmem [shape: f32[16,32], index: 6, kind: input, shape index: {}]   ;;  %s412_s1 = inlined_call_operand.vmem [shape: f32[8,16], index: 1, kind: input, shape index: {}]   ;;  %s413_s9 = inlined_call_operand.vmem [shape: f32[1,128], index: 9, kind: input, shape index: {}]   ;;  %s414_s8 = inlined_call_operand.vmem [shape: f32[32,128], index: 8, kind: input, shape index: {}]  }
   0x1   :  { %v39_v0 = vld [vmem:[%s404_s2 + $0x18] sm:$0xff]  ;;  %v38_v1 = vld [vmem:[%s404_s2 + $0x10] sm:$0xff]  ;;  %v37_v2 = vld [vmem:[%s404_s2 + $0x8] sm:$0xff] }
   0x2   :  { %60 = vmatpush.msra.mxu0 %v39_v0  ;;  %v36_v3 = vld [vmem:[%s404_s2] sm:$0xff]  ;;  %v99_v11 = vld [vmem:[%s408_s4 + $0x18] sm:$0xff]  ;;  %v98_v12 = vld [vmem:[%s408_s4 + $0x10] sm:$0xff] }
   0x3   :  { %v35_v4 = vld [vmem:[%s406_s0] sm:$0xff]  ;;  %119 = vmatpush.msra.mxu1 %v99_v11  ;;  %v97_v14 = vld [vmem:[%s408_s4 + $0x8] sm:$0xff]  ;;  %v198_v52 = vld [vmem:[%s414_s8 + $0x18] sm:$0xff] }
   0x4   :  { %61 = vmatpush.msra.mxu0 %v38_v1  ;;  %v261_v5 = vld [vmem:[%s405_s3] ss:$0 sm:$0xff]  ;;  %v138_v40 = vld [vmem:[%s411_s6 + $0x8] sm:$0xff]  ;;  %v197_v53 = vld [vmem:[%s414_s8 + $0x10] sm:$0xff]  ;;  %218 = vmatpush.msra.mxu3 %v198_v52 }
   0x5   :  { %120 = vmatpush.msra.mxu1 %v98_v12  ;;  %v96_v15 = vld [vmem:[%s408_s4] sm:$0xff]  ;;  %161 = vmatpush.msra.mxu2 %v138_v40  ;;  %v196_v54 = vld [vmem:[%s414_s8 + $0x8] sm:$0xff] }
   0x6   :  { %62 = vmatpush.msra.mxu0 %v37_v2  ;;  %v262_v34 = vld [vmem:[%s407_s5] ss:$0 sm:$0xff]  ;;  %219 = vmatpush.msra.mxu3 %v197_v53 }
   0x7   :  { %121 = vmatpush.msra.mxu1 %v97_v14  ;;  %v137_v41 = vld [vmem:[%s411_s6] sm:$0xff] }
   0x8   :  { %63 = vmatpush.msra.mxu0 %v36_v3  ;;  %162 = vmatpush.msra.mxu2 %v137_v41  ;;  %v127_v42 = vld [vmem:[%s412_s1] sm:$0xff] }
   0x9   :  { %256 = vmatmul.msk.f32.vlgmr.msra.gmra.mxu0 %vm44_vm0, %v35_v4  ;;  %122 = vmatpush.msra.mxu1 %v96_v15  ;;  %v263_v46 = vld [vmem:[%s410_s7] ss:$0 sm:$0xff] }
   0xa   :  { %v195_v55 = vld [vmem:[%s414_s8] sm:$0xff]  ;;  %220 = vmatpush.msra.mxu3 %v196_v54 }
   0xb   :  { %v264_v11 = vld [vmem:[%s413_s9] ss:$0 sm:$0xff] }
   0xc   :  { %221 = vmatpush.msra.mxu3 %v195_v55 }
  0x86   :  { %v65_v6 = vpop.f32.mrf.mxu0 }
  0x87   :  { %v66_v7 = vadd.f32 %v261_v5, %v65_v6 }
  0x89   :  { %v68_v8 = vsel %vm44_vm0, %v66_v7, 0.0  ;;  %v71_v9 = vmul.f32 %v66_v7, %v66_v7 }
  0x8a   :  { %69 = vadd.xlane.f32.xlu0 %v68_v8 }
  0x8b   :  { %v72_v10 = vsel %vm44_vm0, %v71_v9, 0.0 }
  0x92   :  { %73 = vadd.xlane.f32.xlu0 %v72_v10 }
  0xfd   :  { %v70_v13 = vpop.xlane.xlu0 %69 }
  0xfe   :  { %v75_v16 = vmul.f32 0.03125, %v70_v13 }
 0x100   :  { %v77_v18 = vmul.f32 %v75_v16, %v75_v16  ;;  %v80_v29 = vsub.f32 %v66_v7, %v75_v16 }
 0x105   :  { %v74_v17 = vpop.xlane.xlu0 %73 }
 0x106   :  { %v76_v19 = vmul.f32 0.03125, %v74_v17 }
 0x108   :  { %v78_v20 = vsub.f32 %v76_v19, %v77_v18 }
 0x10a   :  { %v79_v21 = vmax.f32 %v78_v20, 0.0 }
 0x10c   :  { %v81_v22 = vadd.f32 1e-05, %v79_v21 }
 0x10e   :  { %265 = vrsqrt.f32 %v81_v22  ;;  %vm88_vm2 = vweird.f32 %v81_v22 }
 0x114   :  { %v266_v23 = vpop.eup %265 }
 0x115   :  { %v83_v24 = vmul.f32 %v266_v23, %v81_v22  ;;  %vm89_vm1 = vweird.f32 %v266_v23 }
 0x116   :  { %vm90_vm3 = vmor %vm88_vm2, %vm89_vm1 }
 0x117   :  { %v84_v25 = vmul.f32 %v266_v23, %v83_v24 }
 0x119   :  { %v85_v26 = vmul.f32 0.5, %v84_v25 }
 0x11b   :  { %v86_v27 = vsub.f32 1.5, %v85_v26 }
 0x11d   :  { %v87_v28 = vmul.f32 %v266_v23, %v86_v27 }
 0x11f   :  { %v91_v30 = vsel %vm90_vm3, %v266_v23, %v87_v28 }
 0x120   :  { %v92_v31 = vmul.f32 %v91_v30, %v80_v29 }
 0x122   :  { %vm93_vm4 = vcmp.ge.f32.partialorder %v92_v31, 0.0  ;;  %v94_v32 = vmul.f32 0.01, %v92_v31 }
 0x124   :  { %v95_v33 = vsel %vm93_vm4, %v92_v31, %v94_v32 }
 0x125   :  { %257 = vmatmul.msk.f32.vlgmr.msra.gmra.mxu1 %vm44_vm0, %v95_v33 }
 0x1a2   :  { %v124_v35 = vpop.f32.mrf.mxu1 }
 0x1a3   :  { %v125_v36 = vadd.f32 %v262_v34, %v124_v35 }
 0x1a5   :  { %v128_v37 = vmul.f32 0.5, %v125_v36  ;;  %250 = vst [vmem:[%s409_s10] sm:$0xff] %v125_v36 }
 0x1a7   :  { %v129_v38 = vmul.f32 1.442695, %v128_v37 }
 0x1a9   :  { %267 = vpow2.f32 %v129_v38 }
 0x1af   :  { %v268_v39 = vpop.eup %267 }
 0x1b0   :  { %132 = vrot.lane.b32.xlu1 %v268_v39, %s275_s13 }
 0x222   :  { %v133_v43 = vpop.permute.xlu1 %132 }
 0x223   :  { %v135_v44 = vmul.f32 %v133_v43, %v127_v42 }
 0x225   :  { %v136_v45 = vadd.f32 %v135_v44, %v125_v36 }
 0x227   :  { %258 = vmatmul.msk.f32.vlgmr.msra.gmra.mxu2 %vm143_vm5, %v136_v45 }
 0x2aa   :  { %v164_v47 = vpop.f32.mrf.mxu2 }
 0x2ab   :  { %v165_v48 = vadd.f32 %v263_v46, %v164_v47 }
 0x2ad   :  { %v167_v49 = vsel %vm44_vm0, %v165_v48, 0.0  ;;  %v170_v50 = vmul.f32 %v165_v48, %v165_v48 }
 0x2ae   :  { %168 = vadd.xlane.f32.xlu1 %v167_v49 }
 0x2af   :  { %v171_v51 = vsel %vm44_vm0, %v170_v50, 0.0 }
 0x2b0   :  { %172 = vadd.xlane.f32.xlu2 %v171_v51 }
 0x321   :  { %v169_v56 = vpop.xlane.xlu1 %168 }
 0x322   :  { %v174_v57 = vmul.f32 0.03125, %v169_v56 }
 0x323   :  { %v173_v58 = vpop.xlane.xlu2 %172 }
 0x324   :  { %v176_v59 = vmul.f32 %v174_v57, %v174_v57  ;;  %v175_v60 = vmul.f32 0.03125, %v173_v58  ;;  %v179_v6 = vsub.f32 %v165_v48, %v174_v57 }
 0x326   :  { %v177_v61 = vsub.f32 %v175_v60, %v176_v59 }
 0x328   :  { %v178_v62 = vmax.f32 %v177_v61, 0.0 }
 0x32a   :  { %v180_v63 = vadd.f32 1e-05, %v178_v62 }
 0x32c   :  { %269 = vrsqrt.f32 %v180_v63  ;;  %vm187_vm7 = vweird.f32 %v180_v63 }
 0x332   :  { %v270_v0 = vpop.eup %269 }
 0x333   :  { %v182_v1 = vmul.f32 %v270_v0, %v180_v63  ;;  %vm188_vm6 = vweird.f32 %v270_v0 }
 0x334   :  { %vm189_vm8 = vmor %vm187_vm7, %vm188_vm6 }
 0x335   :  { %v183_v2 = vmul.f32 %v270_v0, %v182_v1 }
 0x337   :  { %v184_v3 = vmul.f32 0.5, %v183_v2 }
 0x339   :  { %v185_v4 = vsub.f32 1.5, %v184_v3 }
 0x33b   :  { %v186_v5 = vmul.f32 %v270_v0, %v185_v4 }
 0x33d   :  { %v190_v7 = vsel %vm189_vm8, %v270_v0, %v186_v5 }
 0x33e   :  { %v191_v8 = vmul.f32 %v190_v7, %v179_v6 }
 0x340   :  { %vm192_vm9 = vcmp.ge.f32.partialorder %v191_v8, 0.0  ;;  %v193_v9 = vmul.f32 0.01, %v191_v8 }
 0x342   :  { %v194_v10 = vsel %vm192_vm9, %v191_v8, %v193_v9 }
 0x343   :  { %259 = vmatmul.msk.f32.vlgmr.msra.gmra.mxu3 %vm44_vm0, %v194_v10 }
 0x3c6   :  { %v223_v12 = vpop.f32.mrf.mxu3 }
 0x3c7   :  { %v224_v13 = vadd.f32 %v264_v11, %v223_v12 }
 0x3c9   :  { %226 = vadd.xlane.f32.xlu2 %v224_v13  ;;  %v228_v14 = vmul.f32 %v224_v13, %v224_v13 }
 0x3cb   :  { %229 = vadd.xlane.f32.xlu0 %v228_v14 }
 0x43c   :  { %v227_v15 = vpop.xlane.xlu2 %226 }
 0x43d   :  { %v231_v16 = vmul.f32 0.125, %v227_v15 }
 0x43e   :  { %v230_v17 = vpop.xlane.xlu0 %229 }
 0x43f   :  { %v233_v18 = vmul.f32 %v231_v16, %v231_v16  ;;  %v232_v19 = vmul.f32 0.125, %v230_v17  ;;  %v236_v29 = vsub.f32 %v224_v13, %v231_v16 }
 0x441   :  { %v234_v20 = vsub.f32 %v232_v19, %v233_v18 }
 0x443   :  { %v235_v21 = vmax.f32 %v234_v20, 0.0 }
 0x445   :  { %v237_v22 = vadd.f32 1e-05, %v235_v21 }
 0x447   :  { %271 = vrsqrt.f32 %v237_v22  ;;  %vm244_vm11 = vweird.f32 %v237_v22 }
 0x44d   :  { %v272_v23 = vpop.eup %271 }
 0x44e   :  { %v239_v24 = vmul.f32 %v272_v23, %v237_v22  ;;  %vm245_vm10 = vweird.f32 %v272_v23 }
 0x44f   :  { %vm246_vm12 = vmor %vm244_vm11, %vm245_vm10 }
 0x450   :  { %v240_v25 = vmul.f32 %v272_v23, %v239_v24 }
 0x452   :  { %v241_v26 = vmul.f32 0.5, %v240_v25 }
 0x454   :  { %v242_v27 = vsub.f32 1.5, %v241_v26 }
 0x456   :  { %v243_v28 = vmul.f32 %v272_v23, %v242_v27 }
 0x458   :  { %v247_v30 = vsel %vm246_vm12, %v272_v23, %v243_v28 }
 0x459   :  { %v248_v31 = vmul.f32 %v247_v30, %v236_v29 }
 0x45b   :  { %273 = vtanh.f32 %v248_v31 }
 0x461   :  { %v274_v32 = vpop.eup %273 }
 0x462   :  { %251 = vst [vmem:[%s409_s10 + $0x8] sm:$0xff] %v274_v32 }

</bundles_post_ra>
